<compile_context>
chip_gen: v6e
topology: v6e:2x2x1
jax: 0.10.0
libtpu: 0.0.40
codegen_flags: <defaults>
</compile_context>

<pallas_src>
import functools

import jax
import jax.numpy as jnp
from jax import lax
from jax.experimental import pallas as pl
from jax.experimental.pallas import tpu as pltpu


def _round_up(x, m):
    return (x + m - 1) // m * m


def _block_spec(shape, index_map, *, buffers=None):
    """BlockSpec helper; buffers=1 single-buffers grid-invariant operands."""
    if buffers is None:
        return pl.BlockSpec(shape, index_map)
    try:
        return pl.BlockSpec(shape, index_map, pipeline_mode=pl.Buffered(buffers))
    except Exception:  # older jax without pipeline_mode kwarg
        return pl.BlockSpec(shape, index_map)


def _vmem_budget_bytes():
    """Usable VMEM: physical per-core capacity minus headroom (gen-aware)."""
    try:
        cap = int(pltpu.get_tpu_info().vmem_capacity_bytes)
    except Exception:
        cap = 64 << 20  # conservative (v7x-sized) fallback
    return max(cap - (16 << 20), 16 << 20)


def _proj_kernel(x_ref, w_ref, b_ref, o_ref):
    # x_ref: (C, t_hw) channel-major token tile
    # w_ref: (C, E) = torch weight.T;  b_ref: (1, E);  o_ref: (t_hw, E)
    acc = lax.dot_general(
        x_ref[...],
        w_ref[...],
        dimension_numbers=(((0,), (0,)), ((), ())),  # contract over C (fused transpose)
        preferred_element_type=jnp.float32,
    )
    o_ref[...] = (acc + b_ref[...].astype(jnp.float32)).astype(o_ref.dtype)


def _proj_kernel_ksplit(x_ref, w_ref, b_ref, o_ref, acc_ref, *, c_total, t_k):
    # K-split path for large input_dim: trailing "arbitrary" axis over C,
    # f32 VMEM accumulator, init/finalize via pl.when.
    k = pl.program_id(2)

    @pl.when(k == 0)
    def _init():
        acc_ref[...] = jnp.zeros_like(acc_ref)

    x = x_ref[...]
    w = w_ref[...]
    if c_total % t_k != 0:  # static check: ragged last K block -> zero OOB rows
        valid = c_total - k * t_k
        xrow = lax.broadcasted_iota(jnp.int32, x.shape, 0)
        wrow = lax.broadcasted_iota(jnp.int32, w.shape, 0)
        x = jnp.where(xrow < valid, x, 0)
        w = jnp.where(wrow < valid, w, 0)

    acc_ref[...] += lax.dot_general(
        x,
        w,
        dimension_numbers=(((0,), (0,)), ((), ())),
        preferred_element_type=jnp.float32,
    )

    @pl.when(k == pl.num_programs(2) - 1)
    def _finalize():
        o_ref[...] = (acc_ref[...] + b_ref[...].astype(jnp.float32)).astype(o_ref.dtype)


def prepare_mlp_params(weight, bias, dtype):
    """One-time parameter prep hoisted out of the forward hot path.

    weight: torch-style (E, C); bias: (E,).  Returns w_t (C, E) and b_row (1, E).
    """
    w_t = jnp.asarray(weight).T.astype(dtype)
    b_row = jnp.asarray(bias).reshape(1, -1).astype(dtype)
    return w_t, b_row


def mlp_forward(x_nchw, w_t, b_row, *, t_hw=1024):
    """x_nchw: (B, C, H, W); w_t: (C, E); b_row: (1, E). Returns (B, H*W, E)."""
    B, C, H, W = x_nchw.shape
    Cw, E = w_t.shape
    assert Cw == C, (Cw, C)
    HW = H * W

    # Free, contiguous reshape; transpose is fused into the kernel's matmul.
    x_flat = x_nchw.reshape(B, C, HW)

    x_item = jnp.dtype(x_nchw.dtype).itemsize
    w_item = jnp.dtype(w_t.dtype).itemsize
    out_item = x_item

    budget = _vmem_budget_bytes()

    # --- token tile: multiple of 128 unless it covers the full HW extent ---
    if t_hw >= HW:
        t_hw = HW
    else:
        t_hw = max(128, (t_hw // 128) * 128)
    n_hw = pl.cdiv(HW, t_hw)

    # Megacore (v7x: 2 TCs sharded over the "parallel" axes): ensure >= 2 steps.
    if B * n_hw < 2 and HW >= 256:
        t_hw = max(128, _round_up(HW // 2, 128))
        n_hw = pl.cdiv(HW, t_hw)

    def _simple_bytes(thw):
        return (
            2 * C * thw * x_item        # double-buffered x tile
            + 2 * thw * E * out_item    # double-buffered out tile
            + C * E * w_item            # single-buffered weight (Buffered(1))
            + E * w_item                # single-buffered bias
        )

    def _ksplit_bytes(tk, thw):
        return (
            2 * tk * thw * x_item
            + 2 * thw * E * out_item
            + 2 * tk * E * w_item       # weight changes per K step -> double buffered
            + E * w_item
            + thw * E * 4               # f32 accumulator scratch
        )

    # --- pick single-K vs K-split (prefer keeping the token tile large) ---
    t_k = None
    if _simple_bytes(t_hw) > budget:
        for cand in (2048, 1024, 512, 256, 128):
            if cand < C and _ksplit_bytes(cand, t_hw) <= budget:
                t_k = cand
                break
        if t_k is None:
            # Last resort: shrink the token tile as well.
            t_k = 128 if C > 128 else None

            def _fits(thw):
                need = _ksplit_bytes(t_k, thw) if t_k else _simple_bytes(thw)
                return need <= budget

            while t_hw > 128 and not _fits(t_hw):
                t_hw = max(128, ((t_hw // 2) // 128) * 128)
            n_hw = pl.cdiv(HW, t_hw)

    needed = _ksplit_bytes(t_k, t_hw) if t_k else _simple_bytes(t_hw)
    vmem_limit = int(min(max(needed + (8 << 20), 32 << 20), budget))

    cost = pl.CostEstimate(
        flops=2 * B * HW * C * E,
        transcendentals=0,
        bytes_accessed=(
            B * C * HW * x_item + C * E * w_item + E * w_item + B * HW * E * out_item
        ),
    )

    out_shape = jax.ShapeDtypeStruct((B, HW, E), x_nchw.dtype)

    if t_k is None:
        # Single-K path: full C resident in VMEM.
        out = pl.pallas_call(
            _proj_kernel,
            out_shape=out_shape,
            grid_spec=pltpu.PrefetchScalarGridSpec(
                num_scalar_prefetch=0,
                grid=(B, n_hw),
                in_specs=[
                    # Channel-major token tile; transpose fused into the matmul.
                    pl.BlockSpec((None, C, t_hw), lambda b, j: (b, 0, j)),
                    # Grid-invariant weight / bias: single-buffered.
                    _block_spec((C, E), lambda b, j: (0, 0), buffers=1),
                    _block_spec((1, E), lambda b, j: (0, 0), buffers=1),
                ],
                out_specs=pl.BlockSpec((None, t_hw, E), lambda b, j: (b, j, 0)),
            ),
            compiler_params=pltpu.CompilerParams(
                dimension_semantics=("parallel", "parallel"),
                vmem_limit_bytes=vmem_limit,
            ),
            cost_estimate=cost,
        )(x_flat, w_t, b_row)
    else:
        # K-split path: trailing "arbitrary" reduction axis over C.
        n_k = pl.cdiv(C, t_k)
        kernel = functools.partial(_proj_kernel_ksplit, c_total=C, t_k=t_k)
        out = pl.pallas_call(
            kernel,
            out_shape=out_shape,
            grid_spec=pltpu.PrefetchScalarGridSpec(
                num_scalar_prefetch=0,
                grid=(B, n_hw, n_k),
                in_specs=[
                    pl.BlockSpec((None, t_k, t_hw), lambda b, j, k: (b, k, j)),
                    pl.BlockSpec((t_k, E), lambda b, j, k: (k, 0)),
                    _block_spec((1, E), lambda b, j, k: (0, 0), buffers=1),
                ],
                out_specs=pl.BlockSpec((None, t_hw, E), lambda b, j, k: (b, j, 0)),
                scratch_shapes=[pltpu.VMEM((t_hw, E), jnp.float32)],
            ),
            compiler_params=pltpu.CompilerParams(
                dimension_semantics=("parallel", "parallel", "arbitrary"),
                vmem_limit_bytes=vmem_limit,
            ),
            cost_estimate=cost,
        )(x_flat, w_t, b_row)

    return out


def mlp_reference(x_nchw, weight, bias):
    B, C, H, W = x_nchw.shape
    x = jnp.transpose(x_nchw.reshape(B, C, H * W), (0, 2, 1))  # (B, HW, C)
    return x @ weight.T + bias


if __name__ == "__main__":
    # Small shapes consistent with the module: input_dim = C, embed_dim = E.
    B, C, H, W = 2, 4, 16, 16
    E = 32

    key = jax.random.PRNGKey(0)
    kx, kw, kb = jax.random.split(key, 3)

    x = jax.random.normal(kx, (B, C, H, W), dtype=jnp.float32)
    # Deterministic synthetic init of nn.Linear(C, E) parameters (torch layout).
    weight = jax.random.normal(kw, (E, C), dtype=jnp.float32) * 0.02
    bias = jax.random.normal(kb, (E,), dtype=jnp.float32) * 0.02

    # Parameter prep hoisted out of the per-call hot path.
    w_t, b_row = prepare_mlp_params(weight, bias, x.dtype)

    out = mlp_forward(x, w_t, b_row)
    out = jax.block_until_ready(out)

    ref = mlp_reference(x, weight, bias)
    assert out.shape == (B, H * W, E), out.shape
    assert jnp.allclose(out, ref, atol=1e-5, rtol=1e-5), "mismatch vs reference"

    print("KERNEL_OK")
</pallas_src>

<mosaic_0001>
module attributes {stable_mosaic.version = 11 : i64} {
  func.func @_proj_kernel(%arg0: i32, %arg1: i32, %arg2: memref<1x4x256xf32, #tpu.memory_space<vmem>>, %arg3: memref<4x32xf32, #tpu.memory_space<vmem>>, %arg4: memref<1x32xf32, #tpu.memory_space<vmem>>, %arg5: memref<1x256x32xf32, #tpu.memory_space<vmem>>) attributes {dimension_semantics = [#tpu.dimension_semantics<parallel>, #tpu.dimension_semantics<parallel>], iteration_bounds = array<i64: 2, 1>, scalar_prefetch = 0 : i64, scratch_operands = 0 : i64, tpu.core_type = #tpu.core_type<tc>, window_params = [{transform_indices = @transform_0, window_bounds = array<i64: 1, 4, 256>}, {pipeline_mode = #tpu.pipeline_mode<synchronous>, transform_indices = @transform_1, window_bounds = array<i64: 4, 32>}, {pipeline_mode = #tpu.pipeline_mode<synchronous>, transform_indices = @transform_2, window_bounds = array<i64: 1, 32>}, {transform_indices = @transform_3, window_bounds = array<i64: 1, 256, 32>}]} {
    %c0 = arith.constant 0 : index
    %c0_0 = arith.constant 0 : index
    %c0_1 = arith.constant 0 : index
    %0 = vector.load %arg2[%c0, %c0_0, %c0_1] : memref<1x4x256xf32, #tpu.memory_space<vmem>>, vector<1x4x256xf32>
    %1 = vector.shape_cast %0 : vector<1x4x256xf32> to vector<4x256xf32>
    %c0_2 = arith.constant 0 : index
    %c0_3 = arith.constant 0 : index
    %2 = vector.load %arg3[%c0_2, %c0_3] : memref<4x32xf32, #tpu.memory_space<vmem>>, vector<4x32xf32>
    %cst = arith.constant dense<0.000000e+00> : vector<256x32xf32>
    %3 = tpu.matmul %1, %2, %cst {dimension_numbers = #tpu.dot_dimension_numbers<[0], [0], [1], [1], [0, 1, 1, 1], [], []>} : vector<4x256xf32>, vector<4x32xf32>, vector<256x32xf32> -> vector<256x32xf32>
    %c0_4 = arith.constant 0 : index
    %c0_5 = arith.constant 0 : index
    %4 = vector.load %arg4[%c0_4, %c0_5] : memref<1x32xf32, #tpu.memory_space<vmem>>, vector<1x32xf32>
    %5 = vector.broadcast %4 : vector<1x32xf32> to vector<256x32xf32>
    %6 = arith.addf %3, %5 : vector<256x32xf32>
    %c0_6 = arith.constant 0 : index
    %c0_7 = arith.constant 0 : index
    %c0_8 = arith.constant 0 : index
    %7 = vector.load %arg5[%c0_6, %c0_7, %c0_8] : memref<1x256x32xf32, #tpu.memory_space<vmem>>, vector<1x256x32xf32>
    %8 = vector.shape_cast %7 : vector<1x256x32xf32> to vector<256x32xf32>
    %9 = vector.shape_cast %6 : vector<256x32xf32> to vector<1x256x32xf32>
    tpu.vector_store %arg5[%c0_6, %c0_7, %c0_8], %9 {strides = array<i32>} : memref<1x256x32xf32, #tpu.memory_space<vmem>>, vector<1x256x32xf32>,
    return
  }
  func.func @transform_0(%arg0: i32, %arg1: i32) -> (i32, i32, i32) {
    %c0_i32 = arith.constant 0 : i32
    %c0_i32_0 = arith.constant 0 : i32
    return %arg0, %c0_i32, %arg1 : i32, i32, i32
  }
  func.func @transform_1(%arg0: i32, %arg1: i32) -> (i32, i32) {
    %c0_i32 = arith.constant 0 : i32
    %c0_i32_0 = arith.constant 0 : i32
    %c0_i32_1 = arith.constant 0 : i32
    return %c0_i32, %c0_i32_0 : i32, i32
  }
  func.func @transform_2(%arg0: i32, %arg1: i32) -> (i32, i32) {
    %c0_i32 = arith.constant 0 : i32
    %c0_i32_0 = arith.constant 0 : i32
    %c0_i32_1 = arith.constant 0 : i32
    return %c0_i32, %c0_i32_0 : i32, i32
  }
  func.func @transform_3(%arg0: i32, %arg1: i32) -> (i32, i32, i32) {
    %c0_i32 = arith.constant 0 : i32
    %c0_i32_0 = arith.constant 0 : i32
    return %arg0, %arg1, %c0_i32 : i32, i32, i32
  }
}

</mosaic_0001>

<bundles_post_ra>
// kernel: tpu_custom_call.1
= control target key start
LH: loop header
LB: loop body
LE: loop exit
PB: predicated region body
PF: predicated region fallthrough
CT: control target
= control target key end

     0   :  { %8 = vsyncpa [#allocation3], 0  ;;  %s1362_s0 = inlined_call_operand.hbm [shape: f32[2,4,256], index: 0, kind: input, shape index: {}]   ;;  %s1363_s1 = inlined_call_operand.hbm [shape: f32[4,32], index: 1, kind: input, shape index: {}]   ;;  %s1364_s2 = inlined_call_operand.vmem [shape: f32[1,32], index: 2, kind: input, shape index: {}]   ;;  %s1365_s3 = inlined_call_operand.vmem [shape: f32[2,256,32], index: 3, kind: output, shape index: {}]  }
   0x1   :  { %10 = vsyncpa [#allocation3 + $0x1], 0 }
   0x2   :  { %11 = vsyncpa [#allocation5], 0  ;;  %s1106_s12 = smov 0   ;;  %s1108_s13 = smov 0  }
   0x3   :  { %s1110_s14 = smov 0   ;;  %s1112_s15 = smov 0  }
   0x4   :  { %s1114_s16 = smov 0   ;;  %s1116_s17 = smov 0  }
   0x5 LB: > { %s770_s18 = sadd.s32 4294967295, %s1082_s17   ;;  %p51_p0 = scmp.ne.s32.totalorder %s1066_s13, %s1062_s12  ;;  %s1082_s17 = sphi %s1116_s17, %s17_s17   ;;  %s1078_s16 = sphi %s1114_s16, %s1375_s16   ;;  %s1074_s15 = sphi %s1112_s15, %s1374_s15   ;;  %s1070_s14 = sphi %s1110_s14, %s1373_s14   ;;  %s1066_s13 = sphi %s1108_s13, %s1372_s13   ;;  %s1062_s12 = sphi %s1106_s12, %s1371_s12  }
   0x6   : > { %p1136_p1 = scmp.eq.s32.totalorder %s770_s18, 0  ;;  %p772_p2 = scmp.ge.s32.totalorder %s1082_s17, 1 }
   0x7   : > { %p132_p3 = scmp.lt.s32.totalorder %s1082_s17, 3  ;;  %s1084_s22 = smov [#allocation4]  }
   0x8   : > { %p1144_p4 = por %p1136_p1, %p51_p0  ;;  %s145_s23 = sshll.u32 %s1084_s22, 4  ;;  %s146_s23 = int_to_ptr.vmem [resolvable:$true] %s145_s23 }
   0x9   : > { %p1148_p5 = pnand %p772_p2, %p132_p3  ;;  %s29_s25 = sadd.s32 1, %s1078_s16 }
   0xa   : > { %s38_s26 = sadd.s32 1, %s1070_s14  ;;  %p31_p8 = scmp.ge.s32.totalorder %s29_s25, 2 }
   0xb   : > { %p912_p6 = pneg %p1148_p5  ;;  %s985_s27 = scalar_lea.vmem %s146_s23, 64 }
   0xc   : > { %p986_p10 = scmp.ne.s32.totalorder %s146_s23, %s985_s27  ;;  %p993_p13 = scmp.lt.s32.totalorder %s146_s23, %s146_s23 }
   0xd   : > { %p1156_p7 = pnand %p912_p6, %p1136_p1  ;;  %p994_p0 = scmp.lt.s32.totalorder %s985_s27, %s985_s27 }
   0xf   : > { %p976_p9 = pneg %p1156_p7  ;;  %p995_p2 = por %p994_p0, %p993_p13 }
  0x11   : > { %p988_p11 = pnand %p986_p10, %p976_p9 }
  0x13   : > { %p989_p12 = pneg %p988_p11 }
  0x15   : > { %p996_p3 = pnand %p995_p2, %p989_p12 }
  0x17   : > { %999 = shalt.err (!%p996_p3)
}
  0x18   : > { %915 = dma.hbm_to_vmem [thread:$0]  (!%p1156_p7), %s1363_s1, 64, %s146_s23, [#allocation5]  }
  0x19   : > { %s1377_s25 = smov (%p31_p8, %s29_s25), 0  ;;  %p45_p6 = scmp.ne.s32.totalorder %s1070_s14, %s1066_s13 }
  0x1a   : > { %p46_p9 = scmp.eq.s32.totalorder %s1082_s17, 0  ;;  %s33_s30 = ssub.s32 %s1078_s16, %s1377_s25 }
  0x1b   : > { %p921_p10 = scmp.lt.s32.totalorder %s1082_s17, 2  ;;  %p36_p11 = scmp.eq.s32.totalorder %s33_s30, 0 }
  0x1c   : > { %p47_p12 = por %p46_p9, %p45_p6  ;;  %s159_s4 = sand.u32 1, %s1070_s14  }
  0x1d   : > { %s819_s5 = sshll.u32 %s1078_s16, 7  ;;  %s775_s7 = sshll.u32 %s159_s4, 3 }
  0x1e   : > { %s1180_s6 = scalar_select %p36_p11, %s1070_s14, %s38_s26  }
  0x1f   : > { %s171_s10 = scalar_lea.hbm %s1362_s0, %s819_s5  ;;  %s163_s11 = scalar_lea.vmem [#allocation2], %s775_s7 }
  0x20   : > { %s173_s12 = sshll.u32 %s163_s11, 4  ;;  %p1185_p7 = pnand %p921_p10, %p47_p12  ;;  %s174_s12 = int_to_ptr.vmem [resolvable:$true] %s173_s12 }
  0x21   : > { %s160_s22 = scalar_lea.sflag [#allocation3], %s159_s4  ;;  %s1013_s23 = scalar_lea.vmem %s174_s12, 128 }
  0x22   : > { %p1002_p8 = pneg %p1185_p7  ;;  %p1014_p13 = scmp.ne.s32.totalorder %s174_s12, %s1013_s23 }
  0x23   : > { %s1085_s24 = smov [#allocation2]  }
  0x24   : > { %p1016_p0 = pnand %p1014_p13, %p1002_p8  ;;  %s1018_s26 = sshll.u32 %s1085_s24, 4  ;;  %s1019_s26 = int_to_ptr.vmem [resolvable:$false] %s1018_s26 }
  0x25   : > { %s1020_s27 = scalar_lea.vmem %s1019_s26, 256  ;;  %p1021_p3 = scmp.lt.s32.totalorder %s174_s12, %s1019_s26 }
  0x26   : > { %p1017_p2 = pneg %p1016_p0  ;;  %p1022_p6 = scmp.lt.s32.totalorder %s1020_s27, %s1013_s23 }
  0x28   : > { %p1023_p9 = por %p1022_p6, %p1021_p3 }
  0x2a   : > { %p1024_p10 = pnand %p1023_p9, %p1017_p2 }
  0x2c   : > { %1027 = shalt.err (!%p1024_p10)
}
  0x2d   : > { %919 = dma.hbm_to_vmem [thread:$0]  (!%p1185_p7), %s171_s10, 128, %s174_s12, %s160_s22  }
  0x2e   : > { %182 = sbr.rel (%p1148_p5) target bundleno = 502 (0x1f6), region = 32  ;;  %s184_s28 = sand.u32 (!%p1148_p5), 1, %s1066_s13  }
  0x2f   : > { %s779_s29 = sshll.u32 (!%p1148_p5), %s184_s28, 3  ;;  %s185_s30 = scalar_lea.sflag (!%p1148_p5), [#allocation3], %s184_s28 }
  0x30   : > { %s188_s4 = scalar_lea.vmem (!%p1148_p5), [#allocation2], %s779_s29 }
  0x33   : > { %1053 = dma.done.wait (%p1144_p4), %s185_s30, 128  }
  0x34   : > { %1055 = vsyncadd (%p1144_p4), %s185_s30, 4294967168 }
  0x35   : > { %1057 = dma.done.wait (%p1136_p1), [#allocation5], 64  }
  0x36   : > { %1059 = vsyncadd (%p1136_p1), [#allocation5], 4294967232  ;;  %vm403_vm0 = vcmask 1043456   ;;  %v230_v0 = vld [vmem:[%s188_s4] sm:$0xff]  ;;  %v231_v1 = vld [vmem:[#allocation4] sm:$0xf] }
  0x37   : > { %242 = vxpose.xlu0.b32.start.end [1/1] (short) %v230_v0, 128  ;;  %854 = vmatprep.subr.msk.mxu0 %vm403_vm0, %v231_v1  ;;  %v240_v2 = vcombine.high %v230_v0, %v230_v0  ;;  %vm306_vm1 = vcmask 31744   ;;  %p221_p1 = scmp.lt.s32.totalorder %s1074_s15, 1  ;;  %v1241_v35 = vld [vmem:[%s1364_s2] ss:$0 sm:$0xff]  ;;  %vm632_vm2 = vcmask 261120  }
  0x38   : > { %855 = vmatpush3.msk.msra.mxu0 %vm403_vm0, %v231_v1  ;;  %904 = vmatprep.subr.msk.mxu1 %vm403_vm0, %v231_v1 }
  0x39   : > { %905 = vmatpush3.msk.msra.mxu1 %vm403_vm0, %v231_v1  ;;  %s1379_s15 = smov (!%p221_p1, %s1074_s15), 1 }
  0x3a   : > { %s820_s19 = sshll.u32 %s1379_s15, 8 }
  0x3b   : > { %s1246_s8 = scalar_lea.vmem %s1365_s3, %s820_s19 }
  0x74   : > { %274 = vxpose.xlu0.b32.start.end [1/1] (short) %v240_v2, 128 }
  0xb3   : > { %v258_v3 = vpop.trf.xlu0 }
  0xb4   : > { %856 = vmatprep.mubr.msk.f32.mxu0 %vm306_vm1, %v258_v3 }
  0xb7   : > { %v259_v4 = vpop.trf.xlu0 }
  0xb8   : > { %857 = vmatmul.mubr.msk.f32.vlgmr.msra.gmra.mxu0 %vm306_vm1, %v259_v4 }
  0xbb   : > { %v260_v5 = vpop.trf.xlu0 }
  0xbc   : > { %859 = vmatprep.mubr.msk.f32.mxu0 %vm306_vm1, %v260_v5 }
  0xbf   : > { %v261_v6 = vpop.trf.xlu0 }
  0xc0   : > { %860 = vmatmul.mubr.msk.f32.gmra.mxu0 %vm306_vm1, %v261_v6 }
  0xc3   : > { %v262_v7 = vpop.trf.xlu0 }
  0xc4   : > { %862 = vmatprep.mubr.msk.f32.mxu0 %vm306_vm1, %v262_v7 }
  0xc7   : > { %v263_v8 = vpop.trf.xlu0 }
  0xc8   : > { %863 = vmatmul.mubr.msk.f32.gmra.mxu0 %vm306_vm1, %v263_v8 }
  0xcb   : > { %v264_v9 = vpop.trf.xlu0 }
  0xcc   : > { %865 = vmatprep.mubr.msk.f32.mxu0 %vm306_vm1, %v264_v9 }
  0xcf   : > { %v265_v10 = vpop.trf.xlu0 }
  0xd0   : > { %866 = vmatmul.mubr.msk.f32.gmra.mxu0 %vm306_vm1, %v265_v10 }
  0xd3   : > { %v266_v11 = vpop.trf.xlu0 }
  0xd4   : > { %868 = vmatprep.mubr.msk.f32.mxu0 %vm306_vm1, %v266_v11 }
  0xd7   : > { %v267_v12 = vpop.trf.xlu0 }
  0xd8   : > { %869 = vmatmul.mubr.msk.f32.gmra.mxu0 %vm306_vm1, %v267_v12 }
  0xdb   : > { %v268_v13 = vpop.trf.xlu0 }
  0xdc   : > { %871 = vmatprep.mubr.msk.f32.mxu0 %vm306_vm1, %v268_v13 }
  0xdf   : > { %v269_v14 = vpop.trf.xlu0 }
  0xe0   : > { %872 = vmatmul.mubr.msk.f32.gmra.mxu0 %vm306_vm1, %v269_v14 }
  0xe3   : > { %v270_v15 = vpop.trf.xlu0 }
  0xe4   : > { %874 = vmatprep.mubr.msk.f32.mxu0 %vm306_vm1, %v270_v15 }
  0xe7   : > { %v271_v16 = vpop.trf.xlu0 }
  0xe8   : > { %875 = vmatmul.mubr.msk.f32.gmra.mxu0 %vm306_vm1, %v271_v16 }
  0xeb   : > { %v272_v17 = vpop.trf.xlu0 }
  0xec   : > { %877 = vmatprep.mubr.msk.f32.mxu0 %vm306_vm1, %v272_v17 }
  0xef   : > { %v273_v18 = vpop.trf.xlu0 }
  0xf0   : > { %878 = vmatmul.mubr.msk.f32.gmra.mxu0 %vm306_vm1, %v273_v18 }
  0xf3   : > { %v290_v19 = vpop.trf.xlu0 }
  0xf4   : > { %880 = vmatprep.mubr.msk.f32.mxu1 %vm306_vm1, %v290_v19 }
  0xf7   : > { %v291_v20 = vpop.trf.xlu0 }
  0xf8   : > { %881 = vmatmul.mubr.msk.f32.vlgmr.msra.gmra.mxu1 %vm306_vm1, %v291_v20 }
  0xfb   : > { %v292_v21 = vpop.trf.xlu0 }
  0xfc   : > { %883 = vmatprep.mubr.msk.f32.mxu1 %vm306_vm1, %v292_v21 }
  0xff   : > { %v293_v22 = vpop.trf.xlu0 }
 0x100   : > { %884 = vmatmul.mubr.msk.f32.gmra.mxu1 %vm306_vm1, %v293_v22 }
 0x103   : > { %v294_v23 = vpop.trf.xlu0 }
 0x104   : > { %886 = vmatprep.mubr.msk.f32.mxu1 %vm306_vm1, %v294_v23 }
 0x107   : > { %v295_v24 = vpop.trf.xlu0 }
 0x108   : > { %887 = vmatmul.mubr.msk.f32.gmra.mxu1 %vm306_vm1, %v295_v24 }
 0x10b   : > { %v296_v25 = vpop.trf.xlu0 }
 0x10c   : > { %889 = vmatprep.mubr.msk.f32.mxu1 %vm306_vm1, %v296_v25 }
 0x10f   : > { %v297_v26 = vpop.trf.xlu0 }
 0x110   : > { %890 = vmatmul.mubr.msk.f32.gmra.mxu1 %vm306_vm1, %v297_v26 }
 0x113   : > { %v298_v27 = vpop.trf.xlu0 }
 0x114   : > { %892 = vmatprep.mubr.msk.f32.mxu1 %vm306_vm1, %v298_v27 }
 0x117   : > { %v299_v28 = vpop.trf.xlu0 }
 0x118   : > { %893 = vmatmul.mubr.msk.f32.gmra.mxu1 %vm306_vm1, %v299_v28 }
 0x11b   : > { %v300_v29 = vpop.trf.xlu0 }
 0x11c   : > { %895 = vmatprep.mubr.msk.f32.mxu1 %vm306_vm1, %v300_v29 }
 0x11f   : > { %v301_v30 = vpop.trf.xlu0 }
 0x120   : > { %896 = vmatmul.mubr.msk.f32.gmra.mxu1 %vm306_vm1, %v301_v30 }
 0x123   : > { %v302_v31 = vpop.trf.xlu0 }
 0x124   : > { %898 = vmatprep.mubr.msk.f32.mxu1 %vm306_vm1, %v302_v31 }
 0x127   : > { %v303_v32 = vpop.trf.xlu0 }
 0x128   : > { %899 = vmatmul.mubr.msk.f32.gmra.mxu1 %vm306_vm1, %v303_v32 }
 0x12b   : > { %v304_v33 = vpop.trf.xlu0 }
 0x12c   : > { %901 = vmatprep.mubr.msk.f32.mxu1 %vm306_vm1, %v304_v33 }
 0x12f   : > { %v305_v34 = vpop.trf.xlu0 }
 0x130   : > { %902 = vmatmul.mubr.msk.f32.gmra.mxu1 %vm306_vm1, %v305_v34 }
 0x178   : > { %v858_v36 = vpop.f32.mrf.mxu0 }
 0x179   : > { %v479_v37 = vadd.f32 %v858_v36, %v1241_v35 }
 0x17a   : > { %v473_v38 = vpop.f32.mrf.mxu0 }
 0x17b   : > { %634 = vst.msk [vmem:[%s1246_s8 + $0x8] sm:$0xff] %vm632_vm2, %v479_v37  ;;  %v474_v39 = vadd.f32 %v1241_v35, %v473_v38 }
 0x17d   : > { %633 = vst.msk [vmem:[%s1246_s8] sm:$0xff] %vm632_vm2, %v474_v39 }
 0x180   : > { %v861_v40 = vpop.f32.mrf.mxu0 }
 0x181   : > { %v489_v41 = vadd.f32 %v861_v40, %v1241_v35 }
 0x182   : > { %v483_v42 = vpop.f32.mrf.mxu0 }
 0x183   : > { %636 = vst.msk [vmem:[%s1246_s8 + $0x18] sm:$0xff] %vm632_vm2, %v489_v41  ;;  %v484_v43 = vadd.f32 %v1241_v35, %v483_v42 }
 0x185   : > { %635 = vst.msk [vmem:[%s1246_s8 + $0x10] sm:$0xff] %vm632_vm2, %v484_v43 }
 0x188   : > { %v864_v44 = vpop.f32.mrf.mxu0 }
 0x189   : > { %v499_v45 = vadd.f32 %v864_v44, %v1241_v35 }
 0x18a   : > { %v493_v46 = vpop.f32.mrf.mxu0 }
 0x18b   : > { %638 = vst.msk [vmem:[%s1246_s8 + $0x28] sm:$0xff] %vm632_vm2, %v499_v45  ;;  %v494_v47 = vadd.f32 %v1241_v35, %v493_v46 }
 0x18d   : > { %637 = vst.msk [vmem:[%s1246_s8 + $0x20] sm:$0xff] %vm632_vm2, %v494_v47 }
 0x190   : > { %v867_v48 = vpop.f32.mrf.mxu0 }
 0x191   : > { %v509_v49 = vadd.f32 %v867_v48, %v1241_v35 }
 0x192   : > { %v503_v50 = vpop.f32.mrf.mxu0 }
 0x193   : > { %640 = vst.msk [vmem:[%s1246_s8 + $0x38] sm:$0xff] %vm632_vm2, %v509_v49  ;;  %v504_v51 = vadd.f32 %v1241_v35, %v503_v50 }
 0x195   : > { %639 = vst.msk [vmem:[%s1246_s8 + $0x30] sm:$0xff] %vm632_vm2, %v504_v51 }
 0x198   : > { %v870_v52 = vpop.f32.mrf.mxu0 }
 0x199   : > { %v519_v53 = vadd.f32 %v870_v52, %v1241_v35 }
 0x19a   : > { %v513_v54 = vpop.f32.mrf.mxu0 }
 0x19b   : > { %642 = vst.msk [vmem:[%s1246_s8 + $0x48] sm:$0xff] %vm632_vm2, %v519_v53  ;;  %v514_v55 = vadd.f32 %v1241_v35, %v513_v54 }
 0x19d   : > { %641 = vst.msk [vmem:[%s1246_s8 + $0x40] sm:$0xff] %vm632_vm2, %v514_v55 }
 0x1a0   : > { %v873_v56 = vpop.f32.mrf.mxu0 }
 0x1a1   : > { %v529_v57 = vadd.f32 %v873_v56, %v1241_v35 }
 0x1a2   : > { %v523_v58 = vpop.f32.mrf.mxu0 }
 0x1a3   : > { %644 = vst.msk [vmem:[%s1246_s8 + $0x58] sm:$0xff] %vm632_vm2, %v529_v57  ;;  %v524_v59 = vadd.f32 %v1241_v35, %v523_v58 }
 0x1a5   : > { %643 = vst.msk [vmem:[%s1246_s8 + $0x50] sm:$0xff] %vm632_vm2, %v524_v59 }
 0x1a8   : > { %v876_v60 = vpop.f32.mrf.mxu0 }
 0x1a9   : > { %v539_v61 = vadd.f32 %v876_v60, %v1241_v35 }
 0x1aa   : > { %v533_v62 = vpop.f32.mrf.mxu0 }
 0x1ab   : > { %646 = vst.msk [vmem:[%s1246_s8 + $0x68] sm:$0xff] %vm632_vm2, %v539_v61  ;;  %v534_v63 = vadd.f32 %v1241_v35, %v533_v62 }
 0x1ad   : > { %645 = vst.msk [vmem:[%s1246_s8 + $0x60] sm:$0xff] %vm632_vm2, %v534_v63 }
 0x1b0   : > { %v879_v0 = vpop.f32.mrf.mxu0 }
 0x1b1   : > { %v549_v1 = vadd.f32 %v879_v0, %v1241_v35 }
 0x1b2   : > { %v543_v2 = vpop.f32.mrf.mxu0 }
 0x1b3   : > { %648 = vst.msk [vmem:[%s1246_s8 + $0x78] sm:$0xff] %vm632_vm2, %v549_v1  ;;  %v544_v3 = vadd.f32 %v1241_v35, %v543_v2 }
 0x1b5   : > { %647 = vst.msk [vmem:[%s1246_s8 + $0x70] sm:$0xff] %vm632_vm2, %v544_v3 }
 0x1b8   : > { %v882_v4 = vpop.f32.mrf.mxu1 }
 0x1b9   : > { %v559_v5 = vadd.f32 %v882_v4, %v1241_v35 }
 0x1ba   : > { %v553_v6 = vpop.f32.mrf.mxu1 }
 0x1bb   : > { %650 = vst.msk [vmem:[%s1246_s8 + $0x88] sm:$0xff] %vm632_vm2, %v559_v5  ;;  %v554_v7 = vadd.f32 %v1241_v35, %v553_v6 }
 0x1bd   : > { %649 = vst.msk [vmem:[%s1246_s8 + $0x80] sm:$0xff] %vm632_vm2, %v554_v7 }
 0x1c0   : > { %v885_v8 = vpop.f32.mrf.mxu1 }
 0x1c1   : > { %v569_v9 = vadd.f32 %v885_v8, %v1241_v35 }
 0x1c2   : > { %v563_v10 = vpop.f32.mrf.mxu1 }
 0x1c3   : > { %652 = vst.msk [vmem:[%s1246_s8 + $0x98] sm:$0xff] %vm632_vm2, %v569_v9  ;;  %v564_v11 = vadd.f32 %v1241_v35, %v563_v10 }
 0x1c5   : > { %651 = vst.msk [vmem:[%s1246_s8 + $0x90] sm:$0xff] %vm632_vm2, %v564_v11 }
 0x1c8   : > { %v888_v12 = vpop.f32.mrf.mxu1 }
 0x1c9   : > { %v579_v13 = vadd.f32 %v888_v12, %v1241_v35 }
 0x1ca   : > { %v573_v14 = vpop.f32.mrf.mxu1 }
 0x1cb   : > { %654 = vst.msk [vmem:[%s1246_s8 + $0xa8] sm:$0xff] %vm632_vm2, %v579_v13  ;;  %v574_v15 = vadd.f32 %v1241_v35, %v573_v14 }
 0x1cd   : > { %653 = vst.msk [vmem:[%s1246_s8 + $0xa0] sm:$0xff] %vm632_vm2, %v574_v15 }
 0x1d0   : > { %v891_v16 = vpop.f32.mrf.mxu1 }
 0x1d1   : > { %v589_v17 = vadd.f32 %v891_v16, %v1241_v35 }
 0x1d2   : > { %v583_v18 = vpop.f32.mrf.mxu1 }
 0x1d3   : > { %656 = vst.msk [vmem:[%s1246_s8 + $0xb8] sm:$0xff] %vm632_vm2, %v589_v17  ;;  %v584_v19 = vadd.f32 %v1241_v35, %v583_v18 }
 0x1d5   : > { %655 = vst.msk [vmem:[%s1246_s8 + $0xb0] sm:$0xff] %vm632_vm2, %v584_v19 }
 0x1d8   : > { %v894_v20 = vpop.f32.mrf.mxu1 }
 0x1d9   : > { %v599_v21 = vadd.f32 %v894_v20, %v1241_v35 }
 0x1da   : > { %v593_v22 = vpop.f32.mrf.mxu1 }
 0x1db   : > { %658 = vst.msk [vmem:[%s1246_s8 + $0xc8] sm:$0xff] %vm632_vm2, %v599_v21  ;;  %v594_v23 = vadd.f32 %v1241_v35, %v593_v22 }
 0x1dd   : > { %657 = vst.msk [vmem:[%s1246_s8 + $0xc0] sm:$0xff] %vm632_vm2, %v594_v23 }
 0x1e0   : > { %v897_v24 = vpop.f32.mrf.mxu1 }
 0x1e1   : > { %v609_v25 = vadd.f32 %v897_v24, %v1241_v35 }
 0x1e2   : > { %v603_v26 = vpop.f32.mrf.mxu1 }
 0x1e3   : > { %660 = vst.msk [vmem:[%s1246_s8 + $0xd8] sm:$0xff] %vm632_vm2, %v609_v25  ;;  %v604_v27 = vadd.f32 %v1241_v35, %v603_v26 }
 0x1e5   : > { %659 = vst.msk [vmem:[%s1246_s8 + $0xd0] sm:$0xff] %vm632_vm2, %v604_v27 }
 0x1e8   : > { %v900_v28 = vpop.f32.mrf.mxu1 }
 0x1e9   : > { %v619_v29 = vadd.f32 %v900_v28, %v1241_v35 }
 0x1ea   : > { %v613_v30 = vpop.f32.mrf.mxu1 }
 0x1eb   : > { %662 = vst.msk [vmem:[%s1246_s8 + $0xe8] sm:$0xff] %vm632_vm2, %v619_v29  ;;  %v614_v31 = vadd.f32 %v1241_v35, %v613_v30 }
 0x1ed   : > { %661 = vst.msk [vmem:[%s1246_s8 + $0xe0] sm:$0xff] %vm632_vm2, %v614_v31 }
 0x1f0   : > { %v903_v32 = vpop.f32.mrf.mxu1 }
 0x1f1   : > { %v629_v33 = vadd.f32 %v903_v32, %v1241_v35 }
 0x1f2   : > { %v623_v34 = vpop.f32.mrf.mxu1 }
 0x1f3   : > { %664 = vst.msk [vmem:[%s1246_s8 + $0xf8] sm:$0xff] %vm632_vm2, %v629_v33  ;;  %v624_v36 = vadd.f32 %v1241_v35, %v623_v34 }
 0x1f5   : > { %663 = vst.msk [vmem:[%s1246_s8 + $0xf0] sm:$0xff] %vm632_vm2, %v624_v36 }
 0x1f6 PF: > { %s17_s17 = sadd.s32 1, %s1082_s17   ;;  %s1371_s12 = smov %s1066_s13 }
 0x1f7   : > { %p14_p4 = scmp.ge.s32.totalorder %s17_s17, 4   ;;  %s1372_s13 = smov %s1070_s14 }
 0x1f8   : > { %s1373_s14 = smov %s1180_s6  ;;  %s1374_s15 = smov %s1078_s16 }
 0x1f9   : > { %s1375_s16 = smov %s1377_s25  ;;  %16 = sbr.rel (!%p14_p4) target bundleno = 5 (0x5), region = 76 }
 0x1fe   :  { %695 = vsyncpa [#allocation3], 1 }
 0x1ff   :  { %697 = vsyncpa [#allocation3 + $0x1], 1 }
 0x200   :  { %698 = vsyncpa [#allocation5], 1 }

</bundles_post_ra>
